<compile_context>
chip_gen: v7x
topology: tpu7x:2x2x1
jax: 0.10.0
libtpu: 0.0.40
codegen_flags: <defaults>
</compile_context>

<pallas_src>
import functools

import jax
import jax.numpy as jnp
import numpy as np
from jax.experimental import pallas as pl
from jax.experimental.pallas import tpu as pltpu


def _round_up(x, m):
    return (x + m - 1) // m * m


_TILES = (1024, 512, 256, 128, 64, 32, 16, 8)


def _largest_divisor_tile(n, cap):
    for t in _TILES:
        if t <= cap and n % t == 0:
            return t
    return n


def _shrink_tile(t, n):
    h = t // 2
    return h if (h >= 8 and n % h == 0) else t


def _vmem_capacity_bytes():
    try:
        return int(pltpu.get_tpu_info().vmem_capacity_bytes)
    except Exception:
        return 64 << 20  # conservative fallback: v7x per-TensorCore VMEM


# ---------------------------------------------------------------------------
# Pass 1: LayerNorm + fused lane-dense QKV projection (computed once per row).
# ---------------------------------------------------------------------------
def _ln_qkv_kernel(x_ref, g_ref, b_ref, w_ref, qkv_ref, *, true_dim, eps):
    x = x_ref[0]                                      # (tr, Dp) f32, padded cols = 0
    inv_d = 1.0 / true_dim
    mean = jnp.sum(x, axis=-1, keepdims=True) * inv_d
    var = jnp.sum(x * x, axis=-1, keepdims=True) * inv_d - mean * mean
    xn = (x - mean) * jax.lax.rsqrt(var + eps) * g_ref[...] + b_ref[...]
    xn = xn.astype(jnp.bfloat16)                      # padded cols stay exactly 0
    # One lane-dense 2D matmul: (tr, Dp) @ (Dp, Pq), Pq = roundup(3*H*dh, 128).
    qkv = jnp.dot(xn, w_ref[...], preferred_element_type=jnp.float32)
    qkv_ref[0] = qkv.astype(qkv_ref.dtype)


def _ln_qkv_vmem_estimate(tr, dp, pq):
    bf16, f32 = 2, 4
    sub = lambda v: _round_up(max(v, 1), 8)
    blocks = 2 * (sub(tr) * dp * f32            # x block
                  + 2 * 8 * dp * f32            # gamma, beta
                  + dp * pq * bf16              # fused qkv weight
                  + sub(tr) * pq * bf16)        # qkv out block
    temps = sub(tr) * dp * f32 + 2 * sub(tr) * pq * f32
    return blocks + temps


# ---------------------------------------------------------------------------
# Pass 2: flash-style attention (online softmax over kv tiles) + output
# projection + residual add.
# ---------------------------------------------------------------------------
def _flash_attn_kernel(q_ref, k_ref, v_ref, x_ref, wo_ref, bo_ref, o_ref,
                       m_sc, l_sc, acc_sc, *, heads):
    kv = pl.program_id(2)

    @pl.when(kv == 0)
    def _init():
        m_sc[...] = jnp.full(m_sc.shape, -jnp.inf, m_sc.dtype)
        l_sc[...] = jnp.zeros(l_sc.shape, l_sc.dtype)
        acc_sc[...] = jnp.zeros(acc_sc.shape, acc_sc.dtype)

    q = q_ref[0]                                      # (H, tq,  dh) bf16 (scale folded)
    k = k_ref[0]                                      # (H, tkv, dh) bf16
    v = v_ref[0]                                      # (H, tkv, dh) bf16

    # logits: 'hqd,hkd->hqk'
    s = jax.lax.dot_general(q, k, (((2,), (2,)), ((0,), (0,))),
                            preferred_element_type=jnp.float32)       # (H, tq, tkv)
    m_prev = m_sc[...]
    m_new = jnp.maximum(m_prev, jnp.max(s, axis=-1, keepdims=True))
    alpha = jnp.exp(m_prev - m_new)
    p = jnp.exp(s - m_new)
    l_sc[...] = alpha * l_sc[...] + jnp.sum(p, axis=-1, keepdims=True)
    # unnormalized 'hqk,hkd->hqd' -- softmax normalization deferred to finalize
    acc_sc[...] = alpha * acc_sc[...] + jax.lax.dot_general(
        p.astype(jnp.bfloat16), v, (((2,), (1,)), ((0,), (0,))),
        preferred_element_type=jnp.float32)
    m_sc[...] = m_new

    @pl.when(kv == pl.num_programs(2) - 1)
    def _finalize():
        inv_l = pl.reciprocal(l_sc[...], approx=True)                 # EUP slot
        o = (acc_sc[...] * inv_l).astype(jnp.bfloat16)                # (H, tq, dh)
        # Output projection folded head-by-head into one lane-dense (tq, Dp) f32
        # accumulator; bias + residual added into the same accumulator.
        out = x_ref[0] + bo_ref[...]                                  # (tq, Dp) f32
        for h in range(heads):                                        # static unroll
            out = out + jnp.dot(o[h], wo_ref[h],
                                preferred_element_type=jnp.float32)
        o_ref[0] = out.astype(o_ref.dtype)
    # TODO(synk): Dropout in Attention.to_out is identity in eval mode (not modeled).


def _attn_vmem_estimate(tq, tkv, heads, dh, dp):
    bf16, f32 = 2, 4
    lane = lambda v: _round_up(max(v, 1), 128)
    sub = lambda v: _round_up(max(v, 1), 8)
    blocks = 2 * (heads * sub(tq) * lane(dh) * bf16          # q
                  + 2 * heads * sub(tkv) * lane(dh) * bf16   # k, v
                  + 2 * sub(tq) * dp * f32                   # residual x + out
                  + heads * sub(dh) * dp * bf16              # w_o
                  + 8 * dp * f32)                            # b_o
    scratch = (2 * heads * sub(tq) * 128 * f32               # m, l (lane padded)
               + heads * sub(tq) * lane(dh) * f32)           # acc
    temps = 4 * heads * sub(tq) * lane(tkv) * f32            # s / p / alpha temps
    return blocks + scratch + temps


def _attn_tiles(n, heads, dh, dp, budget):
    tq = tkv = _largest_divisor_tile(n, 512)
    while _attn_vmem_estimate(tq, tkv, heads, dh, dp) > budget:
        if tkv >= tq:
            new_tq, new_tkv = tq, _shrink_tile(tkv, n)
        else:
            new_tq, new_tkv = _shrink_tile(tq, n), tkv
        if (new_tq, new_tkv) == (tq, tkv):
            new_tq, new_tkv = _shrink_tile(tq, n), _shrink_tile(tkv, n)
            if (new_tq, new_tkv) == (tq, tkv):
                break
        tq, tkv = new_tq, new_tkv
    return tq, tkv


@functools.partial(jax.jit, static_argnames=("heads", "dim_head", "eps", "interpret"))
def prenorm_attention(x, params, *, heads, dim_head, eps=1e-5, interpret=False):
    """x: (B, N, D) f32.  params: ln_gamma/ln_beta (1,D), w_qkv (D,3*inner),
    w_out (inner,D), b_out (1,D)."""
    B, N, D = x.shape
    inner = heads * dim_head
    assert params["w_qkv"].shape == (D, 3 * inner)
    assert params["w_out"].shape == (inner, D)

    f32, bf16 = jnp.float32, jnp.bfloat16
    Dp = _round_up(D, 128)
    pad = Dp - D
    Pq = _round_up(3 * inner, 128)
    scale = dim_head ** -0.5

    cap = _vmem_capacity_bytes()
    usable = int(cap * 0.85)
    budget = usable // 2               # keep working set <= ~half of VMEM

    # ---- host-side layout prep -------------------------------------------
    xp = x.astype(f32)
    if pad:
        xp = jnp.pad(xp, ((0, 0), (0, 0), (0, pad)))    # lane-dense feature dim
    gamma = jnp.pad(params["ln_gamma"].reshape(1, D).astype(f32), ((0, 0), (0, pad)))
    beta = jnp.pad(params["ln_beta"].reshape(1, D).astype(f32), ((0, 0), (0, pad)))

    # Fused lane-dense QKV weight; 1/sqrt(dh) folded into the q columns.
    w_qkv = params["w_qkv"].astype(f32)
    w_all = jnp.concatenate([w_qkv[:, :inner] * scale, w_qkv[:, inner:]], axis=1)
    w_all = jnp.pad(w_all, ((0, pad), (0, Pq - 3 * inner))).astype(bf16)   # (Dp, Pq)

    w_o = params["w_out"].reshape(heads, dim_head, D).astype(f32)
    w_o = jnp.pad(w_o, ((0, 0), (0, 0), (0, pad))).astype(bf16)            # (H, dh, Dp)
    b_o = jnp.pad(params["b_out"].reshape(1, D).astype(f32), ((0, 0), (0, pad)))

    # ---- pass 1: LayerNorm + QKV projection (once per row) ----------------
    tr = _largest_divisor_tile(N, 1024)
    while (_ln_qkv_vmem_estimate(tr, Dp, Pq) > budget
           and _shrink_tile(tr, N) != tr):
        tr = _shrink_tile(tr, N)
    ln_est = _ln_qkv_vmem_estimate(tr, Dp, Pq)

    qkv_flat = pl.pallas_call(
        functools.partial(_ln_qkv_kernel, true_dim=D, eps=eps),
        out_shape=jax.ShapeDtypeStruct((B, N, Pq), bf16),
        grid=(B, N // tr),
        in_specs=[
            pl.BlockSpec((1, tr, Dp), lambda b, r: (b, r, 0)),   # x rows
            pl.BlockSpec((1, Dp), lambda b, r: (0, 0)),          # gamma
            pl.BlockSpec((1, Dp), lambda b, r: (0, 0)),          # beta
            pl.BlockSpec((Dp, Pq), lambda b, r: (0, 0)),         # fused qkv weight
        ],
        out_specs=pl.BlockSpec((1, tr, Pq), lambda b, r: (b, r, 0)),
        compiler_params=pltpu.CompilerParams(
            dimension_semantics=("parallel", "parallel"),
            vmem_limit_bytes=min(usable, max(2 * ln_est + (8 << 20), 32 << 20))),
        interpret=interpret,
    )(xp, gamma, beta, w_all)

    # Split heads once (single XLA relayout) -> (B, H, N, dh) so the attention
    # pass never lane-slices at non-128 offsets.
    qkv = qkv_flat[:, :, :3 * inner] if Pq != 3 * inner else qkv_flat
    qkv = qkv.reshape(B, N, 3, heads, dim_head).transpose(2, 0, 3, 1, 4)
    q, k, v = qkv[0], qkv[1], qkv[2]                  # each (B, H, N, dh) bf16

    # ---- pass 2: flash attention + out-proj + residual --------------------
    tq, tkv = _attn_tiles(N, heads, dim_head, Dp, budget)
    attn_est = _attn_vmem_estimate(tq, tkv, heads, dim_head, Dp)

    out_padded = pl.pallas_call(
        functools.partial(_flash_attn_kernel, heads=heads),
        out_shape=jax.ShapeDtypeStruct((B, N, Dp), x.dtype),
        grid=(B, N // tq, N // tkv),
        in_specs=[
            pl.BlockSpec((1, heads, tq, dim_head), lambda b, qi, ki: (b, 0, qi, 0)),
            pl.BlockSpec((1, heads, tkv, dim_head), lambda b, qi, ki: (b, 0, ki, 0)),
            pl.BlockSpec((1, heads, tkv, dim_head), lambda b, qi, ki: (b, 0, ki, 0)),
            pl.BlockSpec((1, tq, Dp), lambda b, qi, ki: (b, qi, 0)),    # residual x
            pl.BlockSpec((heads, dim_head, Dp), lambda b, qi, ki: (0, 0, 0)),  # w_o
            pl.BlockSpec((1, Dp), lambda b, qi, ki: (0, 0)),                   # b_o
        ],
        out_specs=pl.BlockSpec((1, tq, Dp), lambda b, qi, ki: (b, qi, 0)),
        scratch_shapes=[
            pltpu.VMEM((heads, tq, 1), jnp.float32),          # m (running max)
            pltpu.VMEM((heads, tq, 1), jnp.float32),          # l (running sum)
            pltpu.VMEM((heads, tq, dim_head), jnp.float32),   # acc (unnormalized PV)
        ],
        compiler_params=pltpu.CompilerParams(
            dimension_semantics=("parallel", "parallel", "arbitrary"),
            vmem_limit_bytes=min(usable, max(2 * attn_est + (8 << 20), 32 << 20))),
        interpret=interpret,
    )(q, k, v, xp, w_o, b_o)

    return out_padded[:, :, :D] if pad else out_padded


# ---------------- pure-JAX reference (f32) for correctness check ----------------
def reference_prenorm_attention(x, params, *, heads, dim_head, eps=1e-5):
    B, N, D = x.shape
    inner = heads * dim_head
    scale = dim_head ** -0.5
    mean = jnp.mean(x, axis=-1, keepdims=True)
    var = jnp.mean((x - mean) ** 2, axis=-1, keepdims=True)
    xn = (x - mean) * jax.lax.rsqrt(var + eps) * params["ln_gamma"] + params["ln_beta"]
    qkv = xn @ params["w_qkv"]
    q, k, v = jnp.split(qkv, 3, axis=-1)
    resh = lambda t: t.reshape(B, N, heads, dim_head).transpose(0, 2, 1, 3)
    q, k, v = resh(q), resh(k), resh(v)
    dots = jnp.einsum("bhid,bhjd->bhij", q, k) * scale
    attn = jax.nn.softmax(dots, axis=-1)
    out = jnp.einsum("bhij,bhjd->bhid", attn, v)
    out = out.transpose(0, 2, 1, 3).reshape(B, N, inner)
    out = out @ params["w_out"] + params["b_out"]
    return out + x


if __name__ == "__main__":
    # Small shapes consistent with the module: x is (batch, seq, dim)
    B, N, D = 2, 8, 32
    HEADS, DIM_HEAD = 4, 8
    INNER = HEADS * DIM_HEAD

    key = jax.random.PRNGKey(0)
    kx, k1, k2, k3, k4, k5 = jax.random.split(key, 6)
    x = jax.random.normal(kx, (B, N, D), jnp.float32)
    params = {
        "ln_gamma": 1.0 + 0.1 * jax.random.normal(k4, (1, D), jnp.float32),
        "ln_beta": 0.05 * jax.random.normal(k5, (1, D), jnp.float32),
        "w_qkv": 0.05 * jax.random.normal(k1, (D, 3 * INNER), jnp.float32),
        "w_out": 0.05 * jax.random.normal(k2, (INNER, D), jnp.float32),
        "b_out": 0.01 * jax.random.normal(k3, (1, D), jnp.float32),
    }

    out = prenorm_attention(x, params, heads=HEADS, dim_head=DIM_HEAD)
    out = jax.block_until_ready(out)

    ref = reference_prenorm_attention(x, params, heads=HEADS, dim_head=DIM_HEAD)
    np.testing.assert_allclose(np.asarray(out), np.asarray(ref), rtol=1e-2, atol=1e-2)

    print("KERNEL_OK")
</pallas_src>

<mosaic_0001>
module attributes {stable_mosaic.version = 11 : i64} {
  func.func @_ln_qkv_kernel(%arg0: i32, %arg1: i32, %arg2: memref<1x8x128xf32, #tpu.memory_space<vmem>>, %arg3: memref<1x128xf32, #tpu.memory_space<vmem>>, %arg4: memref<1x128xf32, #tpu.memory_space<vmem>>, %arg5: memref<128x128xbf16, #tpu.memory_space<vmem>>, %arg6: memref<1x8x128xbf16, #tpu.memory_space<vmem>>) attributes {dimension_semantics = [#tpu.dimension_semantics<parallel>, #tpu.dimension_semantics<parallel>], iteration_bounds = array<i64: 2, 1>, scalar_prefetch = 0 : i64, scratch_operands = 0 : i64, tpu.core_type = #tpu.core_type<tc>, window_params = [{transform_indices = @transform_0, window_bounds = array<i64: 1, 8, 128>}, {pipeline_mode = #tpu.pipeline_mode<synchronous>, transform_indices = @transform_1, window_bounds = array<i64: 1, 128>}, {pipeline_mode = #tpu.pipeline_mode<synchronous>, transform_indices = @transform_2, window_bounds = array<i64: 1, 128>}, {pipeline_mode = #tpu.pipeline_mode<synchronous>, transform_indices = @transform_3, window_bounds = array<i64: 128, 128>}, {transform_indices = @transform_4, window_bounds = array<i64: 1, 8, 128>}]} {
    %c0 = arith.constant 0 : index
    %c0_0 = arith.constant 0 : index
    %c0_1 = arith.constant 0 : index
    %0 = vector.load %arg2[%c0, %c0_0, %c0_1] : memref<1x8x128xf32, #tpu.memory_space<vmem>>, vector<1x8x128xf32>
    %1 = vector.shape_cast %0 : vector<1x8x128xf32> to vector<8x128xf32>
    %cst = arith.constant dense<0.000000e+00> : vector<8xf32>
    %2 = vector.multi_reduction <add>, %1, %cst [1] : vector<8x128xf32> to vector<8xf32>
    %3 = vector.shape_cast %2 : vector<8xf32> to vector<8x1xf32>
    %cst_2 = arith.constant 3.125000e-02 : f32
    %4 = vector.broadcast %cst_2 : f32 to vector<8x1xf32>
    %5 = arith.mulf %3, %4 : vector<8x1xf32>
    %6 = arith.mulf %1, %1 : vector<8x128xf32>
    %cst_3 = arith.constant dense<0.000000e+00> : vector<8xf32>
    %7 = vector.multi_reduction <add>, %6, %cst_3 [1] : vector<8x128xf32> to vector<8xf32>
    %8 = vector.shape_cast %7 : vector<8xf32> to vector<8x1xf32>
    %cst_4 = arith.constant 3.125000e-02 : f32
    %9 = vector.broadcast %cst_4 : f32 to vector<8x1xf32>
    %10 = arith.mulf %8, %9 : vector<8x1xf32>
    %11 = arith.mulf %5, %5 : vector<8x1xf32>
    %12 = arith.subf %10, %11 : vector<8x1xf32>
    %13 = vector.broadcast %5 : vector<8x1xf32> to vector<8x128xf32>
    %14 = arith.subf %1, %13 : vector<8x128xf32>
    %cst_5 = arith.constant 9.99999974E-6 : f32
    %15 = vector.broadcast %cst_5 : f32 to vector<8x1xf32>
    %16 = arith.addf %12, %15 : vector<8x1xf32>
    %17 = math.rsqrt %16 : vector<8x1xf32>
    %18 = vector.broadcast %17 : vector<8x1xf32> to vector<8x128xf32>
    %19 = arith.mulf %14, %18 : vector<8x128xf32>
    %c0_6 = arith.constant 0 : index
    %c0_7 = arith.constant 0 : index
    %20 = vector.load %arg3[%c0_6, %c0_7] : memref<1x128xf32, #tpu.memory_space<vmem>>, vector<1x128xf32>
    %21 = vector.broadcast %20 : vector<1x128xf32> to vector<8x128xf32>
    %22 = arith.mulf %19, %21 : vector<8x128xf32>
    %c0_8 = arith.constant 0 : index
    %c0_9 = arith.constant 0 : index
    %23 = vector.load %arg4[%c0_8, %c0_9] : memref<1x128xf32, #tpu.memory_space<vmem>>, vector<1x128xf32>
    %24 = vector.broadcast %23 : vector<1x128xf32> to vector<8x128xf32>
    %25 = arith.addf %22, %24 : vector<8x128xf32>
    %26 = arith.truncf %25 : vector<8x128xf32> to vector<8x128xbf16>
    %c0_10 = arith.constant 0 : index
    %c0_11 = arith.constant 0 : index
    %27 = vector.load %arg5[%c0_10, %c0_11] : memref<128x128xbf16, #tpu.memory_space<vmem>>, vector<128x128xbf16>
    %cst_12 = arith.constant dense<0.000000e+00> : vector<8x128xf32>
    %28 = tpu.matmul %26, %27, %cst_12 {dimension_numbers = #tpu.dot_dimension_numbers<[1], [0], [0], [1], [0, 0, 1, 1], [], []>} : vector<8x128xbf16>, vector<128x128xbf16>, vector<8x128xf32> -> vector<8x128xf32>
    %29 = arith.truncf %28 : vector<8x128xf32> to vector<8x128xbf16>
    %c0_13 = arith.constant 0 : index
    %c0_14 = arith.constant 0 : index
    %c0_15 = arith.constant 0 : index
    %30 = vector.load %arg6[%c0_13, %c0_14, %c0_15] : memref<1x8x128xbf16, #tpu.memory_space<vmem>>, vector<1x8x128xbf16>
    %31 = vector.shape_cast %30 : vector<1x8x128xbf16> to vector<8x128xbf16>
    %32 = vector.shape_cast %29 : vector<8x128xbf16> to vector<1x8x128xbf16>
    tpu.vector_store %arg6[%c0_13, %c0_14, %c0_15], %32 {strides = array<i32>} : memref<1x8x128xbf16, #tpu.memory_space<vmem>>, vector<1x8x128xbf16>,
    return
  }
  func.func @transform_0(%arg0: i32, %arg1: i32) -> (i32, i32, i32) {
    %c0_i32 = arith.constant 0 : i32
    %c0_i32_0 = arith.constant 0 : i32
    return %arg0, %arg1, %c0_i32 : i32, i32, i32
  }
  func.func @transform_1(%arg0: i32, %arg1: i32) -> (i32, i32) {
    %c0_i32 = arith.constant 0 : i32
    %c0_i32_0 = arith.constant 0 : i32
    %c0_i32_1 = arith.constant 0 : i32
    return %c0_i32, %c0_i32_0 : i32, i32
  }
  func.func @transform_2(%arg0: i32, %arg1: i32) -> (i32, i32) {
    %c0_i32 = arith.constant 0 : i32
    %c0_i32_0 = arith.constant 0 : i32
    %c0_i32_1 = arith.constant 0 : i32
    return %c0_i32, %c0_i32_0 : i32, i32
  }
  func.func @transform_3(%arg0: i32, %arg1: i32) -> (i32, i32) {
    %c0_i32 = arith.constant 0 : i32
    %c0_i32_0 = arith.constant 0 : i32
    %c0_i32_1 = arith.constant 0 : i32
    return %c0_i32, %c0_i32_0 : i32, i32
  }
  func.func @transform_4(%arg0: i32, %arg1: i32) -> (i32, i32, i32) {
    %c0_i32 = arith.constant 0 : i32
    %c0_i32_0 = arith.constant 0 : i32
    return %arg0, %arg1, %c0_i32 : i32, i32, i32
  }
}

module attributes {stable_mosaic.version = 11 : i64} {
  func.func @_flash_attn_kernel(%arg0: i32, %arg1: i32, %arg2: i32, %arg3: memref<1x4x8x8xbf16, #tpu.memory_space<vmem>>, %arg4: memref<1x4x8x8xbf16, #tpu.memory_space<vmem>>, %arg5: memref<1x4x8x8xbf16, #tpu.memory_space<vmem>>, %arg6: memref<1x8x128xf32, #tpu.memory_space<vmem>>, %arg7: memref<4x8x128xbf16, #tpu.memory_space<vmem>>, %arg8: memref<1x128xf32, #tpu.memory_space<vmem>>, %arg9: memref<1x8x128xf32, #tpu.memory_space<vmem>>, %arg10: memref<4x8x1xf32, #tpu.memory_space<vmem>>, %arg11: memref<4x8x1xf32, #tpu.memory_space<vmem>>, %arg12: memref<4x8x8xf32, #tpu.memory_space<vmem>>) attributes {dimension_semantics = [#tpu.dimension_semantics<parallel>, #tpu.dimension_semantics<parallel>, #tpu.dimension_semantics<arbitrary>], iteration_bounds = array<i64: 2, 1, 1>, scalar_prefetch = 0 : i64, scratch_operands = 3 : i64, tpu.core_type = #tpu.core_type<tc>, window_params = [{transform_indices = @transform_0, window_bounds = array<i64: 1, 4, 8, 8>}, {transform_indices = @transform_1, window_bounds = array<i64: 1, 4, 8, 8>}, {transform_indices = @transform_2, window_bounds = array<i64: 1, 4, 8, 8>}, {transform_indices = @transform_3, window_bounds = array<i64: 1, 8, 128>}, {pipeline_mode = #tpu.pipeline_mode<synchronous>, transform_indices = @transform_4, window_bounds = array<i64: 4, 8, 128>}, {pipeline_mode = #tpu.pipeline_mode<synchronous>, transform_indices = @transform_5, window_bounds = array<i64: 1, 128>}, {transform_indices = @transform_6, window_bounds = array<i64: 1, 8, 128>}]} {
    %c0_i32 = arith.constant 0 : i32
    %0 = arith.cmpi eq, %arg2, %c0_i32 : i32
    %1 = arith.extui %0 : i1 to i32
    %c0_i32_0 = arith.constant 0 : i32
    %2 = arith.cmpi ne, %1, %c0_i32_0 : i32
    scf.if %2 {
      %cst_35 = arith.constant 0xFF800000 : f32
      %36 = vector.broadcast %cst_35 : f32 to vector<4x8x1xf32>
      %c0_36 = arith.constant 0 : index
      %c0_37 = arith.constant 0 : index
      %c0_38 = arith.constant 0 : index
      %37 = vector.load %arg10[%c0_36, %c0_37, %c0_38] : memref<4x8x1xf32, #tpu.memory_space<vmem>>, vector<4x8x1xf32>
      tpu.vector_store %arg10[%c0_36, %c0_37, %c0_38], %36 {strides = array<i32>} : memref<4x8x1xf32, #tpu.memory_space<vmem>>, vector<4x8x1xf32>,
      %cst_39 = arith.constant 0.000000e+00 : f32
      %38 = vector.broadcast %cst_39 : f32 to vector<4x8x1xf32>
      %c0_40 = arith.constant 0 : index
      %c0_41 = arith.constant 0 : index
      %c0_42 = arith.constant 0 : index
      %39 = vector.load %arg11[%c0_40, %c0_41, %c0_42] : memref<4x8x1xf32, #tpu.memory_space<vmem>>, vector<4x8x1xf32>
      tpu.vector_store %arg11[%c0_40, %c0_41, %c0_42], %38 {strides = array<i32>} : memref<4x8x1xf32, #tpu.memory_space<vmem>>, vector<4x8x1xf32>,
      %cst_43 = arith.constant 0.000000e+00 : f32
      %40 = vector.broadcast %cst_43 : f32 to vector<4x8x8xf32>
      %c0_44 = arith.constant 0 : index
      %c0_45 = arith.constant 0 : index
      %c0_46 = arith.constant 0 : index
      %41 = vector.load %arg12[%c0_44, %c0_45, %c0_46] : memref<4x8x8xf32, #tpu.memory_space<vmem>>, vector<4x8x8xf32>
      tpu.vector_store %arg12[%c0_44, %c0_45, %c0_46], %40 {strides = array<i32>} : memref<4x8x8xf32, #tpu.memory_space<vmem>>, vector<4x8x8xf32>,
    } else {
    }
    %c0 = arith.constant 0 : index
    %c0_1 = arith.constant 0 : index
    %c0_2 = arith.constant 0 : index
    %c0_3 = arith.constant 0 : index
    %3 = vector.load %arg3[%c0, %c0_1, %c0_2, %c0_3] : memref<1x4x8x8xbf16, #tpu.memory_space<vmem>>, vector<1x4x8x8xbf16>
    %4 = vector.shape_cast %3 : vector<1x4x8x8xbf16> to vector<4x8x8xbf16>
    %c0_4 = arith.constant 0 : index
    %c0_5 = arith.constant 0 : index
    %c0_6 = arith.constant 0 : index
    %c0_7 = arith.constant 0 : index
    %5 = vector.load %arg4[%c0_4, %c0_5, %c0_6, %c0_7] : memref<1x4x8x8xbf16, #tpu.memory_space<vmem>>, vector<1x4x8x8xbf16>
    %6 = vector.shape_cast %5 : vector<1x4x8x8xbf16> to vector<4x8x8xbf16>
    %c0_8 = arith.constant 0 : index
    %c0_9 = arith.constant 0 : index
    %c0_10 = arith.constant 0 : index
    %c0_11 = arith.constant 0 : index
    %7 = vector.load %arg5[%c0_8, %c0_9, %c0_10, %c0_11] : memref<1x4x8x8xbf16, #tpu.memory_space<vmem>>, vector<1x4x8x8xbf16>
    %8 = vector.shape_cast %7 : vector<1x4x8x8xbf16> to vector<4x8x8xbf16>
    %cst = arith.constant dense<0.000000e+00> : vector<4x8x8xf32>
    %9 = tpu.matmul %4, %6, %cst {dimension_numbers = #tpu.dot_dimension_numbers<[2], [2], [1], [1], [0, 0, 0, 1, 1, 1], [0], [0]>} : vector<4x8x8xbf16>, vector<4x8x8xbf16>, vector<4x8x8xf32> -> vector<4x8x8xf32>
    %c0_12 = arith.constant 0 : index
    %c0_13 = arith.constant 0 : index
    %c0_14 = arith.constant 0 : index
    %10 = vector.load %arg10[%c0_12, %c0_13, %c0_14] : memref<4x8x1xf32, #tpu.memory_space<vmem>>, vector<4x8x1xf32>
    %cst_15 = arith.constant dense<0xFF800000> : vector<4x8xf32>
    %11 = vector.multi_reduction <maximumf>, %9, %cst_15 [2] : vector<4x8x8xf32> to vector<4x8xf32>
    %12 = vector.shape_cast %11 : vector<4x8xf32> to vector<4x8x1xf32>
    %13 = arith.maximumf %10, %12 : vector<4x8x1xf32>
    %14 = arith.subf %10, %13 : vector<4x8x1xf32>
    %15 = math.exp %14 : vector<4x8x1xf32>
    %16 = vector.broadcast %13 : vector<4x8x1xf32> to vector<4x8x8xf32>
    %17 = arith.subf %9, %16 : vector<4x8x8xf32>
    %18 = math.exp %17 : vector<4x8x8xf32>
    %c0_16 = arith.constant 0 : index
    %c0_17 = arith.constant 0 : index
    %c0_18 = arith.constant 0 : index
    %19 = vector.load %arg11[%c0_16, %c0_17, %c0_18] : memref<4x8x1xf32, #tpu.memory_space<vmem>>, vector<4x8x1xf32>
    %20 = arith.mulf %15, %19 : vector<4x8x1xf32>
    %cst_19 = arith.constant dense<0.000000e+00> : vector<4x8xf32>
    %21 = vector.multi_reduction <add>, %18, %cst_19 [2] : vector<4x8x8xf32> to vector<4x8xf32>
    %22 = vector.shape_cast %21 : vector<4x8xf32> to vector<4x8x1xf32>
    %23 = arith.addf %20, %22 : vector<4x8x1xf32>
    %c0_20 = arith.constant 0 : index
    %c0_21 = arith.constant 0 : index
    %c0_22 = arith.constant 0 : index
    %24 = vector.load %arg11[%c0_20, %c0_21, %c0_22] : memref<4x8x1xf32, #tpu.memory_space<vmem>>, vector<4x8x1xf32>
    tpu.vector_store %arg11[%c0_20, %c0_21, %c0_22], %23 {strides = array<i32>} : memref<4x8x1xf32, #tpu.memory_space<vmem>>, vector<4x8x1xf32>,
    %c0_23 = arith.constant 0 : index
    %c0_24 = arith.constant 0 : index
    %c0_25 = arith.constant 0 : index
    %25 = vector.load %arg12[%c0_23, %c0_24, %c0_25] : memref<4x8x8xf32, #tpu.memory_space<vmem>>, vector<4x8x8xf32>
    %26 = vector.broadcast %15 : vector<4x8x1xf32> to vector<4x8x8xf32>
    %27 = arith.mulf %26, %25 : vector<4x8x8xf32>
    %28 = arith.truncf %18 : vector<4x8x8xf32> to vector<4x8x8xbf16>
    %cst_26 = arith.constant dense<0.000000e+00> : vector<4x8x8xf32>
    %29 = tpu.matmul %28, %8, %cst_26 {dimension_numbers = #tpu.dot_dimension_numbers<[2], [1], [1], [2], [0, 0, 0, 1, 1, 2], [0], [0]>} : vector<4x8x8xbf16>, vector<4x8x8xbf16>, vector<4x8x8xf32> -> vector<4x8x8xf32>
    %30 = arith.addf %27, %29 : vector<4x8x8xf32>
    %c0_27 = arith.constant 0 : index
    %c0_28 = arith.constant 0 : index
    %c0_29 = arith.constant 0 : index
    %31 = vector.load %arg12[%c0_27, %c0_28, %c0_29] : memref<4x8x8xf32, #tpu.memory_space<vmem>>, vector<4x8x8xf32>
    tpu.vector_store %arg12[%c0_27, %c0_28, %c0_29], %30 {strides = array<i32>} : memref<4x8x8xf32, #tpu.memory_space<vmem>>, vector<4x8x8xf32>,
    %c0_30 = arith.constant 0 : index
    %c0_31 = arith.constant 0 : index
    %c0_32 = arith.constant 0 : index
    %32 = vector.load %arg10[%c0_30, %c0_31, %c0_32] : memref<4x8x1xf32, #tpu.memory_space<vmem>>, vector<4x8x1xf32>
    tpu.vector_store %arg10[%c0_30, %c0_31, %c0_32], %13 {strides = array<i32>} : memref<4x8x1xf32, #tpu.memory_space<vmem>>, vector<4x8x1xf32>,
    %c0_i32_33 = arith.constant 0 : i32
    %33 = arith.cmpi eq, %arg2, %c0_i32_33 : i32
    %34 = arith.extui %33 : i1 to i32
    %c0_i32_34 = arith.constant 0 : i32
    %35 = arith.cmpi ne, %34, %c0_i32_34 : i32
    scf.if %35 {
      %c0_35 = arith.constant 0 : index
      %c0_36 = arith.constant 0 : index
      %c0_37 = arith.constant 0 : index
      %36 = vector.load %arg11[%c0_35, %c0_36, %c0_37] : memref<4x8x1xf32, #tpu.memory_space<vmem>>, vector<4x8x1xf32>
      %37 = tpu.reciprocal %36 {approx = true} : vector<4x8x1xf32> -> vector<4x8x1xf32>
      %c0_38 = arith.constant 0 : index
      %c0_39 = arith.constant 0 : index
      %c0_40 = arith.constant 0 : index
      %38 = vector.load %arg12[%c0_38, %c0_39, %c0_40] : memref<4x8x8xf32, #tpu.memory_space<vmem>>, vector<4x8x8xf32>
      %39 = vector.broadcast %37 : vector<4x8x1xf32> to vector<4x8x8xf32>
      %40 = arith.mulf %38, %39 : vector<4x8x8xf32>
      %41 = arith.truncf %40 : vector<4x8x8xf32> to vector<4x8x8xbf16>
      %c0_41 = arith.constant 0 : index
      %c0_42 = arith.constant 0 : index
      %c0_43 = arith.constant 0 : index
      %42 = vector.load %arg6[%c0_41, %c0_42, %c0_43] : memref<1x8x128xf32, #tpu.memory_space<vmem>>, vector<1x8x128xf32>
      %43 = vector.shape_cast %42 : vector<1x8x128xf32> to vector<8x128xf32>
      %c0_44 = arith.constant 0 : index
      %c0_45 = arith.constant 0 : index
      %44 = vector.load %arg8[%c0_44, %c0_45] : memref<1x128xf32, #tpu.memory_space<vmem>>, vector<1x128xf32>
      %45 = vector.broadcast %44 : vector<1x128xf32> to vector<8x128xf32>
      %46 = arith.addf %43, %45 : vector<8x128xf32>
      %47 = vector.extract_strided_slice %41 {offsets = [0, 0, 0], sizes = [1, 8, 8], strides = [1, 1, 1]} : vector<4x8x8xbf16> to vector<1x8x8xbf16>
      %48 = vector.shape_cast %47 : vector<1x8x8xbf16> to vector<8x8xbf16>
      %c0_46 = arith.constant 0 : index
      %c0_47 = arith.constant 0 : index
      %c0_48 = arith.constant 0 : index
      %49 = vector.load %arg7[%c0_46, %c0_47, %c0_48] : memref<4x8x128xbf16, #tpu.memory_space<vmem>>, vector<1x8x128xbf16>
      %50 = vector.shape_cast %49 : vector<1x8x128xbf16> to vector<8x128xbf16>
      %cst_49 = arith.constant dense<0.000000e+00> : vector<8x128xf32>
      %51 = tpu.matmul %48, %50, %cst_49 {dimension_numbers = #tpu.dot_dimension_numbers<[1], [0], [0], [1], [0, 0, 1, 1], [], []>} : vector<8x8xbf16>, vector<8x128xbf16>, vector<8x128xf32> -> vector<8x128xf32>
      %52 = arith.addf %46, %51 : vector<8x128xf32>
      %53 = vector.extract_strided_slice %41 {offsets = [1, 0, 0], sizes = [1, 8, 8], strides = [1, 1, 1]} : vector<4x8x8xbf16> to vector<1x8x8xbf16>
      %54 = vector.shape_cast %53 : vector<1x8x8xbf16> to vector<8x8xbf16>
      %c1 = arith.constant 1 : index
      %c0_50 = arith.constant 0 : index
      %c0_51 = arith.constant 0 : index
      %55 = vector.load %arg7[%c1, %c0_50, %c0_51] : memref<4x8x128xbf16, #tpu.memory_space<vmem>>, vector<1x8x128xbf16>
      %56 = vector.shape_cast %55 : vector<1x8x128xbf16> to vector<8x128xbf16>
      %cst_52 = arith.constant dense<0.000000e+00> : vector<8x128xf32>
      %57 = tpu.matmul %54, %56, %cst_52 {dimension_numbers = #tpu.dot_dimension_numbers<[1], [0], [0], [1], [0, 0, 1, 1], [], []>} : vector<8x8xbf16>, vector<8x128xbf16>, vector<8x128xf32> -> vector<8x128xf32>
      %58 = arith.addf %52, %57 : vector<8x128xf32>
      %59 = vector.extract_strided_slice %41 {offsets = [2, 0, 0], sizes = [1, 8, 8], strides = [1, 1, 1]} : vector<4x8x8xbf16> to vector<1x8x8xbf16>
      %60 = vector.shape_cast %59 : vector<1x8x8xbf16> to vector<8x8xbf16>
      %c2 = arith.constant 2 : index
      %c0_53 = arith.constant 0 : index
      %c0_54 = arith.constant 0 : index
      %61 = vector.load %arg7[%c2, %c0_53, %c0_54] : memref<4x8x128xbf16, #tpu.memory_space<vmem>>, vector<1x8x128xbf16>
      %62 = vector.shape_cast %61 : vector<1x8x128xbf16> to vector<8x128xbf16>
      %cst_55 = arith.constant dense<0.000000e+00> : vector<8x128xf32>
      %63 = tpu.matmul %60, %62, %cst_55 {dimension_numbers = #tpu.dot_dimension_numbers<[1], [0], [0], [1], [0, 0, 1, 1], [], []>} : vector<8x8xbf16>, vector<8x128xbf16>, vector<8x128xf32> -> vector<8x128xf32>
      %64 = arith.addf %58, %63 : vector<8x128xf32>
      %65 = vector.extract_strided_slice %41 {offsets = [3, 0, 0], sizes = [1, 8, 8], strides = [1, 1, 1]} : vector<4x8x8xbf16> to vector<1x8x8xbf16>
      %66 = vector.shape_cast %65 : vector<1x8x8xbf16> to vector<8x8xbf16>
      %c3 = arith.constant 3 : index
      %c0_56 = arith.constant 0 : index
      %c0_57 = arith.constant 0 : index
      %67 = vector.load %arg7[%c3, %c0_56, %c0_57] : memref<4x8x128xbf16, #tpu.memory_space<vmem>>, vector<1x8x128xbf16>
      %68 = vector.shape_cast %67 : vector<1x8x128xbf16> to vector<8x128xbf16>
      %cst_58 = arith.constant dense<0.000000e+00> : vector<8x128xf32>
      %69 = tpu.matmul %66, %68, %cst_58 {dimension_numbers = #tpu.dot_dimension_numbers<[1], [0], [0], [1], [0, 0, 1, 1], [], []>} : vector<8x8xbf16>, vector<8x128xbf16>, vector<8x128xf32> -> vector<8x128xf32>
      %70 = arith.addf %64, %69 : vector<8x128xf32>
      %c0_59 = arith.constant 0 : index
      %c0_60 = arith.constant 0 : index
      %c0_61 = arith.constant 0 : index
      %71 = vector.load %arg9[%c0_59, %c0_60, %c0_61] : memref<1x8x128xf32, #tpu.memory_space<vmem>>, vector<1x8x128xf32>
      %72 = vector.shape_cast %71 : vector<1x8x128xf32> to vector<8x128xf32>
      %73 = vector.shape_cast %70 : vector<8x128xf32> to vector<1x8x128xf32>
      tpu.vector_store %arg9[%c0_59, %c0_60, %c0_61], %73 {strides = array<i32>} : memref<1x8x128xf32, #tpu.memory_space<vmem>>, vector<1x8x128xf32>,
    } else {
    }
    return
  }
  func.func @transform_0(%arg0: i32, %arg1: i32, %arg2: i32) -> (i32, i32, i32, i32) {
    %c0_i32 = arith.constant 0 : i32
    %c0_i32_0 = arith.constant 0 : i32
    %c0_i32_1 = arith.constant 0 : i32
    return %arg0, %c0_i32, %arg1, %c0_i32_0 : i32, i32, i32, i32
  }
  func.func @transform_1(%arg0: i32, %arg1: i32, %arg2: i32) -> (i32, i32, i32, i32) {
    %c0_i32 = arith.constant 0 : i32
    %c0_i32_0 = arith.constant 0 : i32
    %c0_i32_1 = arith.constant 0 : i32
    return %arg0, %c0_i32, %arg2, %c0_i32_0 : i32, i32, i32, i32
  }
  func.func @transform_2(%arg0: i32, %arg1: i32, %arg2: i32) -> (i32, i32, i32, i32) {
    %c0_i32 = arith.constant 0 : i32
    %c0_i32_0 = arith.constant 0 : i32
    %c0_i32_1 = arith.constant 0 : i32
    return %arg0, %c0_i32, %arg2, %c0_i32_0 : i32, i32, i32, i32
  }
  func.func @transform_3(%arg0: i32, %arg1: i32, %arg2: i32) -> (i32, i32, i32) {
    %c0_i32 = arith.constant 0 : i32
    %c0_i32_0 = arith.constant 0 : i32
    return %arg0, %arg1, %c0_i32 : i32, i32, i32
  }
  func.func @transform_4(%arg0: i32, %arg1: i32, %arg2: i32) -> (i32, i32, i32) {
    %c0_i32 = arith.constant 0 : i32
    %c0_i32_0 = arith.constant 0 : i32
    %c0_i32_1 = arith.constant 0 : i32
    %c0_i32_2 = arith.constant 0 : i32
    return %c0_i32, %c0_i32_0, %c0_i32_1 : i32, i32, i32
  }
  func.func @transform_5(%arg0: i32, %arg1: i32, %arg2: i32) -> (i32, i32) {
    %c0_i32 = arith.constant 0 : i32
    %c0_i32_0 = arith.constant 0 : i32
    %c0_i32_1 = arith.constant 0 : i32
    return %c0_i32, %c0_i32_0 : i32, i32
  }
  func.func @transform_6(%arg0: i32, %arg1: i32, %arg2: i32) -> (i32, i32, i32) {
    %c0_i32 = arith.constant 0 : i32
    %c0_i32_0 = arith.constant 0 : i32
    return %arg0, %arg1, %c0_i32 : i32, i32, i32
  }
}

</mosaic_0001>

<bundles_post_ra>
// kernel: prenorm_attention.2
= control target key start
LH: loop header
LB: loop body
LE: loop exit
PB: predicated region body
PF: predicated region fallthrough
CT: control target
= control target key end

     0   :  { %s571_s15 = smov 0   ;;  %s573_s16 = smov 0   ;;  %s638_s0 = inlined_call_operand.vmem [shape: f32[2,8,128], index: 0, kind: input, shape index: {}]   ;;  %s639_s1 = inlined_call_operand.vmem [shape: f32[1,128], index: 1, kind: input, shape index: {}]   ;;  %s640_s2 = inlined_call_operand.vmem [shape: f32[1,128], index: 2, kind: input, shape index: {}]   ;;  %s641_s3 = inlined_call_operand.vmem [shape: bf16[128,128], index: 3, kind: input, shape index: {}]   ;;  %s642_s4 = inlined_call_operand.vmem [shape: bf16[2,8,128], index: 4, kind: output, shape index: {}]  }
   0x1   :  { %s575_s17 = smov 0  }
   0x2 LB: > { %s26_s18 = sadd.s32 1, %s538_s16  ;;  %p440_p0 = scmp.ge.s32.totalorder %s542_s17, 1  ;;  %s542_s17 = sphi %s575_s17, %s14_s17   ;;  %s538_s16 = sphi %s573_s16, %s644_s16   ;;  %s534_s15 = sphi %s571_s15, %s643_s15  }
   0x3   : > { %p28_p1 = scmp.ge.s32.totalorder %s26_s18, 2  ;;  %p180_p2 = scmp.lt.s32.totalorder %s542_s17, 3 }
   0x5   : > { %s646_s18 = smov (%p28_p1, %s26_s18), 0  ;;  %p181_p3 = pnand %p440_p0, %p180_p2 }
   0x6   : > { %p210_p4 = scmp.lt.s32.totalorder (!%p181_p3), %s534_s15, 1  ;;  %v544_v0 = vmov (!%p181_p3), 0.0   ;;  %v510_v1 = vld [vmem:[%s641_s3] sm:$0xff] (!%p181_p3)   ;;  %v511_v4 = vld [vmem:[%s641_s3 + $0x8] sm:$0xff] (!%p181_p3)   ;;  %v512_v5 = vld [vmem:[%s641_s3 + $0x10] sm:$0xff] (!%p181_p3)   ;;  %vm545_vm0 = vmmov (!%p181_p3), 0  }
   0x7   : > { %184 = sbr.rel (%p181_p3) target bundleno = 404 (0x194), region = 36  ;;  %464 = vmatprep.subr.bf16.mxu0 (!%p181_p3), %v544_v0  ;;  %v513_v6 = vld [vmem:[%s641_s3 + $0x18] sm:$0xff] (!%p181_p3)   ;;  %v514_v7 = vld [vmem:[%s641_s3 + $0x20] sm:$0xff] (!%p181_p3)   ;;  %480 = vmatprep.mubr.msk.bf16.mxu0 (!%p181_p3), %vm545_vm0, %v544_v0  ;;  %v515_v8 = vld [vmem:[%s641_s3 + $0x28] sm:$0xff] (!%p181_p3)  }
   0x8   : > { %465 = vmatpush3.bf16.msra.mxu0 (!%p181_p3), %v510_v1  ;;  %v516_v9 = vld [vmem:[%s641_s3 + $0x30] sm:$0xff] (!%p181_p3)   ;;  %v517_v10 = vld [vmem:[%s641_s3 + $0x38] sm:$0xff] (!%p181_p3)   ;;  %v443_v20 = vld [vmem:[%s639_s1] ss:$0 sm:$0xff] (!%p181_p3) }
   0x9   : > { %466 = vmatprep.subr.bf16.mxu0 (!%p181_p3), %v544_v0  ;;  %v444_v22 = vld [vmem:[%s640_s2] ss:$0 sm:$0xff] (!%p181_p3) }
   0xc   : > { %467 = vmatpush3.bf16.msra.mxu0 (!%p181_p3), %v511_v4 }
   0xd   : > { %468 = vmatprep.subr.bf16.mxu0 (!%p181_p3), %v544_v0 }
   0xe   : > { %s648_s15 = smov (!%p210_p4, %s534_s15), 1 }
   0xf   : > { %s441_s21 = sshll.u32 %s648_s15, 3 }
  0x10   : > { %s216_s24 = scalar_lea.vmem %s638_s0, %s441_s21  ;;  %469 = vmatpush3.bf16.msra.mxu0 %v512_v5  ;;  %s442_s21 = sshll.u32 %s648_s15, 2 }
  0x11   : > { %v225_v2 = vld [vmem:[%s216_s24] sm:$0xff]  ;;  %470 = vmatprep.subr.bf16.mxu0 %v544_v0  ;;  %s223_s24 = scalar_lea.vmem %s642_s4, %s442_s21 }
  0x12   : > { %226 = vadd.xlane.f32.xlu0 %v225_v2  ;;  %v229_v3 = vmul.f32 %v225_v2, %v225_v2 }
  0x14   : > { %471 = vmatpush3.bf16.msra.mxu0 %v513_v6 }
  0x15   : > { %472 = vmatprep.subr.bf16.mxu0 %v544_v0 }
  0x16   : > { %230 = vadd.xlane.f32.xlu0 %v229_v3 }
  0x18   : > { %473 = vmatpush3.bf16.msra.mxu0 %v514_v7 }
  0x19   : > { %474 = vmatprep.subr.bf16.mxu0 %v544_v0 }
  0x1c   : > { %475 = vmatpush3.bf16.msra.mxu0 %v515_v8 }
  0x1d   : > { %476 = vmatprep.subr.bf16.mxu0 %v544_v0 }
  0x20   : > { %477 = vmatpush3.bf16.msra.mxu0 %v516_v9 }
  0x21   : > { %478 = vmatprep.subr.bf16.mxu0 %v544_v0 }
  0x24   : > { %479 = vmatpush3.bf16.msra.mxu0 %v517_v10 }
  0x9f   : > { %v227_v11 = vpop.xlane.xlu0 %226 }
  0xa0   : > { %v228_v12 = vmul.f32 0.03125, %v227_v11 }
  0xa2   : > { %v233_v14 = vmul.f32 %v228_v12, %v228_v12  ;;  %v235_v18 = vsub.f32 %v225_v2, %v228_v12 }
  0xa3   : > { %v231_v13 = vpop.xlane.xlu0 %230 }
  0xa4   : > { %v232_v15 = vmul.f32 0.03125, %v231_v13 }
  0xa6   : > { %v234_v16 = vsub.f32 %v232_v15, %v233_v14 }
  0xa8   : > { %v236_v17 = vadd.f32 1e-05, %v234_v16 }
  0xaa   : > { %518 = vrsqrt.f32 %v236_v17 }
  0xb4   : > { %v519_v19 = vpop.eup %518 }
  0xb5   : > { %v238_v21 = vmul.f32 %v519_v19, %v235_v18 }
  0xb7   : > { %v246_v23 = vmul.f32 %v443_v20, %v238_v21 }
  0xb9   : > { %v254_v24 = vadd.f32 %v444_v22, %v246_v23 }
  0xbb   : > { %v255_v25 = vpack.c.bf16 %v254_v24, %v254_v24 }
  0xbd   : > { %481 = vmatmul.mubr.bf16.vlgmr.msra.gmra.mrb[0].mxu0 %v255_v25 }
 0x190   : > { %v354_v26 = vpop.f32.mrb[0].mxu0 }
 0x191   : > { %v360_v27 = vpack.c.bf16 %v354_v26, %v354_v26  ;;  %v482_v28 = vpop.f32.mrb[1].mxu0 }
 0x192   : > { %v357_v29 = vpop.f32.mrb[2].mxu0 }
 0x193   : > { %361 = vst [vmem:[%s223_s24] sm:$0xf] %v360_v27  ;;  %v483_v30 = vpop.f32.mrb[3].mxu0 }
 0x194 PF: > { %s14_s17 = sadd.s32 1, %s542_s17   ;;  %s643_s15 = smov %s538_s16 }
 0x195   : > { %p11_p5 = scmp.ge.s32.totalorder %s14_s17, 4   ;;  %s644_s16 = smov %s646_s18 }
 0x197   :  { %13 = sbr.rel (!%p11_p5) target bundleno = 2 (0x2), region = 66 }

// kernel: prenorm_attention.3
= control target key start
LH: loop header
LB: loop body
LE: loop exit
PB: predicated region body
PF: predicated region fallthrough
CT: control target
= control target key end

     0   :  { %11 = vsyncpa [#allocation6], 0  ;;  %s1942_s0 = inlined_call_operand.vmem [shape: bf16[2,4,8,8], index: 0, kind: input, shape index: {}]   ;;  %s1943_s1 = inlined_call_operand.vmem [shape: bf16[2,4,8,8], index: 1, kind: input, shape index: {}]   ;;  %s1944_s2 = inlined_call_operand.vmem [shape: bf16[2,4,8,8], index: 2, kind: input, shape index: {}]   ;;  %s1945_s3 = inlined_call_operand.vmem [shape: f32[2,8,128], index: 3, kind: input, shape index: {}]   ;;  %s1946_s4 = inlined_call_operand.vmem [shape: bf16[4,8,128], index: 4, kind: input, shape index: {}]   ;;  %s1947_s5 = inlined_call_operand.vmem [shape: f32[1,128], index: 5, kind: input, shape index: {}]   ;;  %s1948_s6 = inlined_call_operand.hbm [shape: f32[2,8,128], index: 6, kind: output, shape index: {}]  }
   0x1   :  { %13 = vsyncpa [#allocation6 + $0x1], 0  ;;  %s1651_s21 = smov 0   ;;  %s1653_s22 = smov 0  }
   0x2   :  { %s1655_s23 = smov 0   ;;  %s1657_s24 = smov 0  }
   0x3   :  { %s1659_s25 = smov 0   ;;  %s1661_s26 = smov 0  }
   0x4 LB: > { %s1301_s27 = sadd.s32 4294967295, %s1609_s26   ;;  %s1302_s28 = sadd.s32 4294967294, %s1609_s26   ;;  %s1609_s26 = sphi %s1661_s26, %s19_s26   ;;  %s1605_s25 = sphi %s1659_s25, %s1955_s25   ;;  %s1601_s24 = sphi %s1657_s24, %s1954_s24   ;;  %s1597_s23 = sphi %s1655_s23, %s1953_s23   ;;  %s1593_s22 = sphi %s1653_s22, %s1952_s22   ;;  %s1589_s21 = sphi %s1651_s21, %s1951_s21  }
   0x5   : > { %s38_s29 = sadd.s32 1, %s1605_s25  ;;  %s201_s30 = sadd.s32 1, %s1597_s23 }
   0x6   : > { %p40_p0 = scmp.ge.s32.totalorder %s38_s29, 2  ;;  %p211_p1 = scmp.ne.s32.totalorder %s1597_s23, %s1593_s22 }
   0x7   : > { %p212_p2 = scmp.eq.s32.totalorder %s1301_s27, 1  ;;  %p217_p3 = scmp.ne.s32.totalorder %s1593_s22, %s1589_s21 }
   0x8   : > { %s1957_s29 = smov (%p40_p0, %s38_s29), 0  ;;  %p218_p5 = scmp.eq.s32.totalorder %s1302_s28, 1 }
   0x9   : > { %p1691_p4 = por %p212_p2, %p211_p1  ;;  %s196_s8 = ssub.s32 %s1605_s25, %s1957_s29 }
   0xa   : > { %p1305_p6 = scmp.ge.s32.totalorder %s1609_s26, 1  ;;  %p199_p7 = scmp.eq.s32.totalorder %s196_s8, 0 }
   0xb   : > { %p1698_p8 = por %p218_p5, %p217_p3  ;;  %p285_p9 = scmp.lt.s32.totalorder %s1609_s26, 3 }
   0xc   : > { %s1704_s10 = scalar_select %p199_p7, %s1597_s23, %s201_s30  }
   0xd   : > { %p286_p10 = pnand %p1305_p6, %p285_p9 }
   0xe   : > { %p341_p11 = scmp.lt.s32.totalorder (!%p286_p10), %s1601_s24, 1  ;;  %vm386_vm0 = vcmask (!%p286_p10), 64512   ;;  %v1611_v0 = vmov (!%p286_p10), 0.0   ;;  %vm1612_vm1 = vmmov (!%p286_p10), 0   ;;  %vm377_vm2 = vcmask (!%p286_p10), 7168   ;;  %s1615_s19 = smov (!%p286_p10), [#allocation5]  }
   0xf   : > { %289 = sbr.rel (%p286_p10) target bundleno = 1095 (0x447), region = 44  ;;  %1361 = vmatprep.subr.bf16.mxu1 (!%p286_p10), %v1611_v0  ;;  %387 = vst.msk [vmem:[#allocation4] sm:$0xff] (!%p286_p10), %vm386_vm0, %v1611_v0  ;;  %388 = vst.msk [vmem:[#allocation4 + $0x8] sm:$0xff] (!%p286_p10), %vm386_vm0, %v1611_v0  ;;  %1363 = vmatprep.mubr.msk.bf16.mxu1 (!%p286_p10), %vm1612_vm1, %v1611_v0  ;;  %v1613_v13 = vmov (!%p286_p10), -inf   ;;  %v1614_v27 = vmov (!%p286_p10), 0   ;;  %vm716_vm3 = vcmask (!%p286_p10), 1043456  }
  0x10   : > { %389 = vst.msk [vmem:[#allocation4 + $0x10] sm:$0xff] (!%p286_p10), %vm386_vm0, %v1611_v0  ;;  %390 = vst.msk [vmem:[#allocation4 + $0x18] sm:$0xff] (!%p286_p10), %vm386_vm0, %v1611_v0  ;;  %1385 = vmatprep.subr.bf16.mxu0 (!%p286_p10), %v1611_v0  ;;  %1387 = vmatprep.mubr.msk.bf16.mxu0 (!%p286_p10), %vm1612_vm1, %v1611_v0  ;;  %s1535_s20 = sshll.u32 (!%p286_p10), %s1615_s19, 4  ;;  %s1536_s20 = int_to_ptr.vmem [resolvable:$false] %s1535_s20 }
  0x11   : > { %378 = vst.msk [vmem:[#allocation2] sm:$0xff] (!%p286_p10), %vm377_vm2, %v1613_v13  ;;  %379 = vst.msk [vmem:[#allocation2 + $0x8] sm:$0xff] (!%p286_p10), %vm377_vm2, %v1613_v13  ;;  %1505 = vset.pattern.permute.xlu0 (!%p286_p10), %v1614_v27  ;;  %1506 = vset.pattern.permute.xlu1 (!%p286_p10), %v1614_v27 }
  0x12   : > { %380 = vst.msk [vmem:[#allocation2 + $0x10] sm:$0xff] (!%p286_p10), %vm377_vm2, %v1613_v13  ;;  %381 = vst.msk [vmem:[#allocation2 + $0x18] sm:$0xff] (!%p286_p10), %vm377_vm2, %v1613_v13 }
  0x13   : > { %382 = vst.msk [vmem:[#allocation3] sm:$0xff] (!%p286_p10), %vm377_vm2, %v1611_v0  ;;  %383 = vst.msk [vmem:[#allocation3 + $0x8] sm:$0xff] (!%p286_p10), %vm377_vm2, %v1611_v0 }
  0x14   : > { %384 = vst.msk [vmem:[#allocation3 + $0x10] sm:$0xff] (!%p286_p10), %vm377_vm2, %v1611_v0  ;;  %385 = vst.msk [vmem:[#allocation3 + $0x18] sm:$0xff] (!%p286_p10), %vm377_vm2, %v1611_v0 }
  0x16   : > { %s1719_s11 = scalar_select %p341_p11, %s1601_s24, 1 }
  0x18   : > { %s1725_s12 = sshll.u32 %s1719_s11, 4  ;;  %v1780_v35 = vld [vmem:[#allocation2] sm:$0xff]  ;;  %v1790_v39 = vld [vmem:[#allocation2 + $0x8] sm:$0xff]  ;;  %s1313_s17 = sshll.u32 %s1719_s11, 3 }
  0x19   : > { %s356_s15 = scalar_lea.vmem %s1943_s1, %s1725_s12  ;;  %s348_s18 = scalar_lea.vmem %s1942_s0, %s1725_s12  ;;  %v1795_v43 = vld [vmem:[#allocation2 + $0x10] sm:$0xff]  ;;  %v591_v49 = vld [vmem:[#allocation2 + $0x18] sm:$0xff] }
  0x1a   : > { %v395_v1 = vld [vmem:[%s356_s15] sm:$0xf]  ;;  %v396_v3 = vld [vmem:[%s356_s15 + $0x4] sm:$0xf]  ;;  %v397_v6 = vld [vmem:[%s356_s15 + $0x8] sm:$0xf]  ;;  %s1801_s27 = scalar_lea.vmem %s1944_s2, %s1725_s12 }
  0x1b   : > { %v408_v2 = vsel %vm386_vm0, %v395_v1, 0  ;;  %v391_v4 = vld [vmem:[%s348_s18] sm:$0xf]  ;;  %v454_v5 = vsel %vm386_vm0, %v396_v3, 0  ;;  %v392_v7 = vld [vmem:[%s348_s18 + $0x4] sm:$0xf] }
  0x1c   : > { %1362 = vmatpush3.bf16.xpose.msra.mxu1 %v408_v2  ;;  %v500_v8 = vsel %vm386_vm0, %v397_v6, 0  ;;  %v398_v9 = vld [vmem:[%s356_s15 + $0xc] sm:$0xf]  ;;  %v393_v10 = vld [vmem:[%s348_s18 + $0x8] sm:$0xf]  ;;  %s1331_s12 = sshll.u32 %s1601_s24, 7 }
  0x1d   : > { %1367 = vmatprep.subr.bf16.mxu1 %v1611_v0  ;;  %v546_v11 = vsel %vm386_vm0, %v398_v9, 0  ;;  %v394_v12 = vld [vmem:[%s348_s18 + $0xc] sm:$0xf]  ;;  %v399_v44 = vld [vmem:[%s1801_s27] sm:$0xf]  ;;  %s338_s18 = sand.u32 1, %s1593_s22   ;;  %s1895_s16 = scalar_lea.hbm %s1948_s6, %s1331_s12 }
  0x1e   : > { %v718_v46 = vsel %vm716_vm3, %v399_v44, 0  ;;  %v400_v50 = vld [vmem:[%s1801_s27 + $0x4] sm:$0xf]  ;;  %v401_v61 = vld [vmem:[%s1801_s27 + $0x8] sm:$0xf]  ;;  %v655_v44 = vld [vmem:[#allocation3 + $0x18] sm:$0xff] }
  0x1f   : > { %1386 = vmatpush3.bf16.msra.mxu0 %v718_v46  ;;  %v764_v52 = vsel %vm716_vm3, %v400_v50, 0  ;;  %v810_v3 = vsel %vm716_vm3, %v401_v61, 0  ;;  %v402_v6 = vld [vmem:[%s1801_s27 + $0xc] sm:$0xf]  ;;  %s371_s27 = scalar_lea.vmem %s1945_s3, %s1313_s17  ;;  %s1306_s28 = sshll.u32 %s338_s18, 3 }
  0x20   : > { %1397 = vmatprep.subr.bf16.mxu0 %v1611_v0  ;;  %s340_s13 = scalar_lea.vmem [#allocation5], %s1306_s28  ;;  %s1159_s17 = scalar_lea.sflag [#allocation6], %s338_s18 }
  0x21   : > { %s1173_s14 = sshll.u32 %s340_s13, 4  ;;  %s1897_s14 = int_to_ptr.vmem [resolvable:$true] %s1173_s14 }
  0x22   : > { %s1531_s24 = scalar_lea.vmem %s1897_s14, 128  ;;  %p1538_p1 = scmp.lt.s32.totalorder %s1897_s14, %s1536_s20 }
  0x23   : > { %1364 = vmatmul.mubr.msk.bf16.vlgmr.msra.gmra.mrb[0].mxu1 %vm386_vm0, %v391_v4  ;;  %p1532_p12 = scmp.ne.s32.totalorder %s1897_s14, %s1531_s24 }
  0x24   : > { %1368 = vmatpush3.bf16.xpose.msra.mxu1 %v454_v5  ;;  %1369 = vmatprep.mubr.msk.bf16.mxu1 %vm1612_vm1, %v1611_v0 }
  0x25   : > { %1373 = vmatprep.subr.bf16.mxu1 %v1611_v0  ;;  %p1533_p13 = pnand %p1532_p12, %p1691_p4 }
  0x27   : > { %p1534_p0 = pneg %p1533_p13 }
  0x2b   : > { %1370 = vmatmul.mubr.msk.bf16.vlgmr.msra.gmra.mrb[4].mxu1 %vm386_vm0, %v392_v7 }
  0x2c   : > { %1374 = vmatpush3.bf16.xpose.msra.mxu1 %v500_v8  ;;  %1375 = vmatprep.mubr.msk.bf16.mxu1 %vm1612_vm1, %v1611_v0 }
  0x2d   : > { %1379 = vmatprep.subr.bf16.mxu1 %v1611_v0 }
  0x33   : > { %1376 = vmatmul.mubr.msk.bf16.vlgmr.msra.gmra.mrb[8].mxu1 %vm386_vm0, %v393_v10 }
  0x34   : > { %1380 = vmatpush3.bf16.xpose.msra.mxu1 %v546_v11  ;;  %1381 = vmatprep.mubr.msk.bf16.mxu1 %vm1612_vm1, %v1611_v0  ;;  %v856_v11 = vsel %vm716_vm3, %v402_v6, 0 }
  0x35   : > { %1391 = vmatprep.subr.bf16.mxu1 %v1611_v0 }
  0x3b   : > { %1382 = vmatmul.mubr.msk.bf16.vlgmr.msra.gmra.mrb[12].mxu1 %vm386_vm0, %v394_v12 }
  0x3c   : > { %1393 = vmatprep.mubr.msk.bf16.mxu1 %vm1612_vm1, %v1611_v0  ;;  %1392 = vmatpush3.bf16.msra.mxu1 %v764_v52 }
  0x3d   : > { %1403 = vmatprep.subr.bf16.mxu1 %v1611_v0 }
  0xf6   : > { %v1767_v14 = vpop.f32.mrb[0].mxu1 }
  0xf7   : > { %v1365_v15 = vpop.f32.mrb[1].mxu1  ;;  %v592_v16 = vsel %vm386_vm0, %v1767_v14, -inf }
  0xf8   : > { %593 = vmax.xlane.f32.xlu0 %v592_v16  ;;  %v447_v17 = vpop.f32.mrb[2].mxu1 }
  0xf9   : > { %v1366_v18 = vpop.f32.mrb[3].mxu1 }
  0xfe   : > { %v490_v19 = vpop.f32.mrb[4].mxu1 }
  0xff   : > { %v595_v20 = vsel %vm386_vm0, %v490_v19, -inf  ;;  %v1371_v21 = vpop.f32.mrb[5].mxu1 }
 0x100   : > { %596 = vmax.xlane.f32.xlu0 %v595_v20  ;;  %v493_v22 = vpop.f32.mrb[6].mxu1 }
 0x101   : > { %v1372_v23 = vpop.f32.mrb[7].mxu1 }
 0x106   : > { %v1772_v24 = vpop.f32.mrb[8].mxu1 }
 0x107   : > { %v598_v25 = vsel %vm386_vm0, %v1772_v24, -inf  ;;  %v1377_v26 = vpop.f32.mrb[9].mxu1 }
 0x108   : > { %599 = vmax.xlane.f32.xlu1 %v598_v25  ;;  %v539_v28 = vpop.f32.mrb[10].mxu1  ;;  %v962_v26 = vld [vmem:[%s1946_s4] sm:$0xf] }
 0x109   : > { %v1378_v29 = vpop.f32.mrb[11].mxu1  ;;  %v967_v27 = vsel %vm716_vm3, %v962_v26, 0  ;;  %v652_v28 = vld [vmem:[#allocation3] sm:$0xff] }
 0x10e   : > { %v1776_v30 = vpop.f32.mrb[12].mxu1 }
 0x10f   : > { %v601_v31 = vsel %vm386_vm0, %v1776_v30, -inf  ;;  %v1383_v32 = vpop.f32.mrb[13].mxu1 }
 0x110   : > { %602 = vmax.xlane.f32.xlu1 %v601_v31  ;;  %v585_v33 = vpop.f32.mrb[14].mxu1 }
 0x111   : > { %v1384_v34 = vpop.f32.mrb[15].mxu1  ;;  %v653_v33 = vld [vmem:[#allocation3 + $0x8] sm:$0xff] }
 0x185   : > { %v594_v36 = vpop.xlane.xlu0 %593 }
 0x186   : > { %v1783_v37 = vmax.f32 %v1780_v35, %v594_v36 }
 0x188   : > { %v608_v38 = vsub.f32 %v1780_v35, %v1783_v37  ;;  %906 = vst.msk [vmem:[#allocation2] sm:$0xff] %vm377_vm2, %v1783_v37  ;;  %622 = vperm.xlu0 %1505, %v1783_v37  }
 0x18a   : > { %v612_v22 = vmul.f32 1.442695, %v608_v38 }
 0x18d   : > { %v597_v40 = vpop.xlane.xlu0 %596 }
 0x18e   : > { %v605_v41 = vmax.f32 %v1790_v39, %v597_v40 }
 0x190   : > { %v609_v42 = vsub.f32 %v1790_v39, %v605_v41  ;;  %907 = vst.msk [vmem:[#allocation2 + $0x8] sm:$0xff] %vm377_vm2, %v605_v41  ;;  %627 = vperm.xlu1 %1506, %v605_v41   ;;  %v654_v39 = vld [vmem:[#allocation3 + $0x10] sm:$0xff] }
 0x192   : > { %v614_v15 = vmul.f32 1.442695, %v609_v42 }
 0x195   : > { %v600_v45 = vpop.xlane.xlu1 %599 }
 0x196   : > { %v1806_v47 = vmax.f32 %v1795_v43, %v600_v45 }
 0x198   : > { %v610_v48 = vsub.f32 %v1795_v43, %v1806_v47  ;;  %908 = vst.msk [vmem:[#allocation2 + $0x10] sm:$0xff] %vm377_vm2, %v1806_v47  ;;  %632 = vperm.xlu1 %1506, %v1806_v47  }
 0x19a   : > { %v616_v29 = vmul.f32 1.442695, %v610_v48 }
 0x19d   : > { %v603_v51 = vpop.xlane.xlu1 %602 }
 0x19e   : > { %v607_v53 = vmax.f32 %v591_v49, %v603_v51 }
 0x1a0   : > { %v611_v54 = vsub.f32 %v591_v49, %v607_v53  ;;  %909 = vst.msk [vmem:[#allocation2 + $0x18] sm:$0xff] %vm377_vm2, %v607_v53  ;;  %637 = vperm.xlu1 %1506, %v607_v53  }
 0x1a2   : > { %v618_v18 = vmul.f32 1.442695, %v611_v54  ;;  %v681_v54 = vld [vmem:[#allocation4] sm:$0xff] }
 0x207   : > { %v623_v55 = vpop.permute.xlu0 %622 }
 0x208   : > { %v640_v56 = vsub.f32 %v1767_v14, %v623_v55 }
 0x20a   : > { %v644_v57 = vmul.f32 1.442695, %v640_v56 }
 0x20c   : > { %1507 = vpow2.f32 %v644_v57 }
 0x20f   : > { %v628_v58 = vpop.permute.xlu1 %627 }
 0x210   : > { %v641_v59 = vsub.f32 %v490_v19, %v628_v58 }
 0x212   : > { %v646_v60 = vmul.f32 1.442695, %v641_v59 }
 0x214   : > { %1509 = vpow2.f32 %v646_v60 }
 0x216   : > { %v1508_v62 = vpop.eup %1507 }
 0x217   : > { %v633_v63 = vpop.permute.xlu1 %632  ;;  %v660_v1 = vsel %vm386_vm0, %v1508_v62, 0.0  ;;  %v709_v2 = vpack.c.bf16 %v1508_v62, %v1508_v62  ;;  %v682_v62 = vld [vmem:[#allocation4 + $0x8] sm:$0xff] }
 0x218   : > { %v642_v4 = vsub.f32 %v1772_v24, %v633_v63  ;;  %661 = vadd.xlane.f32.xlu1 %v660_v1 }
 0x219   : > { %1388 = vmatmul.mubr.msk.bf16.vlgmr.msra.gmra.mrb[0].mxu0 %vm386_vm0, %v709_v2 }
 0x21a   : > { %v648_v5 = vmul.f32 1.442695, %v642_v4  ;;  %1398 = vmatpush3.bf16.msra.mxu0 %v810_v3  ;;  %1399 = vmatprep.mubr.msk.bf16.mxu0 %vm1612_vm1, %v1611_v0 }
 0x21b   : > { %1409 = vmatprep.subr.bf16.mxu0 %v1611_v0 }
 0x21c   : > { %1511 = vpow2.f32 %v648_v5 }
 0x21e   : > { %v1510_v7 = vpop.eup %1509 }
 0x21f   : > { %v638_v8 = vpop.permute.xlu1 %637  ;;  %v663_v9 = vsel %vm386_vm0, %v1510_v7, 0.0  ;;  %v710_v10 = vpack.c.bf16 %v1510_v7, %v1510_v7 }
 0x220   : > { %v643_v12 = vsub.f32 %v1776_v30, %v638_v8  ;;  %664 = vadd.xlane.f32.xlu0 %v663_v9 }
 0x221   : > { %1394 = vmatmul.mubr.msk.bf16.vlgmr.msra.gmra.mrb[16].mxu1 %vm386_vm0, %v710_v10 }
 0x222   : > { %v650_v13 = vmul.f32 1.442695, %v643_v12  ;;  %1404 = vmatpush3.bf16.msra.mxu1 %v856_v11  ;;  %1405 = vmatprep.mubr.msk.bf16.mxu1 %vm1612_vm1, %v1611_v0  ;;  %v684_v11 = vld [vmem:[#allocation4 + $0x18] sm:$0xff] }
 0x224   : > { %1513 = vpow2.f32 %v650_v13 }
 0x225   : > { %1515 = vpow2.f32 %v614_v15 }
 0x226   : > { %v1512_v14 = vpop.eup %1511  ;;  %1517 = vpow2.f32 %v618_v18 }
 0x227   : > { %v666_v16 = vsel %vm386_vm0, %v1512_v14, 0.0  ;;  %v711_v17 = vpack.c.bf16 %v1512_v14, %v1512_v14  ;;  %1519 = vpow2.f32 %v612_v22 }
 0x228   : > { %667 = vadd.xlane.f32.xlu1 %v666_v16  ;;  %1521 = vpow2.f32 %v616_v29 }
 0x229   : > { %1400 = vmatmul.mubr.msk.bf16.vlgmr.msra.gmra.mrb[4].mxu0 %vm386_vm0, %v711_v17 }
 0x22a   : > { %1411 = vmatprep.mubr.msk.bf16.mxu0 %vm1612_vm1, %v1611_v0  ;;  %1410 = vmatpush3.bf16.msra.mxu0 %v967_v27 }
 0x22b   : > { %1415 = vmatprep.subr.bf16.mxu0 %v1611_v0 }
 0x22e   : > { %v1514_v19 = vpop.eup %1513 }
 0x22f   : > { %v669_v20 = vsel %vm386_vm0, %v1514_v19, 0.0  ;;  %v712_v21 = vpack.c.bf16 %v1514_v19, %v1514_v19  ;;  %v1516_v23 = vpop.eup %1515 }
 0x230   : > { %670 = vadd.xlane.f32.xlu1 %v669_v20  ;;  %v1518_v24 = vpop.eup %1517  ;;  %v657_v34 = vmul.f32 %v1516_v23, %v653_v33 }
 0x231   : > { %1406 = vmatmul.mubr.msk.bf16.vlgmr.msra.gmra.mrb[20].mxu1 %vm386_vm0, %v712_v21  ;;  %v1520_v25 = vpop.eup %1519  ;;  %v659_v46 = vmul.f32 %v1518_v24, %v655_v44  ;;  %v1324_v21 = vld [vmem:[%s1946_s4 + $0x4] sm:$0xf] }
 0x232   : > { %v656_v30 = vmul.f32 %v1520_v25, %v652_v28  ;;  %v1522_v38 = vpop.eup %1521 }
 0x233   : > { %v658_v40 = vmul.f32 %v1522_v38, %v654_v39 }
 0x236   : > { %692 = vperm.xlu0 %1505, %v1516_v23   ;;  %v683_v23 = vld [vmem:[#allocation4 + $0x10] sm:$0xff] }
 0x23a   : > { %702 = vperm.xlu0 %1505, %v1518_v24  }
 0x241   : > { %687 = vperm.xlu1 %1506, %v1520_v25   ;;  %v1016_v25 = vsel %vm716_vm3, %v1324_v21, 0 }
 0x2a5   : > { %v662_v31 = vpop.xlane.xlu1 %661 }
 0x2a6   : > { %v672_v32 = vadd.f32 %v662_v31, %v656_v30 }
 0x2a8   : > { %677 = vst.msk [vmem:[#allocation3] sm:$0xff] %vm377_vm2, %v672_v32  ;;  %v1326_v32 = vld [vmem:[%s1946_s4 + $0x8] sm:$0xf] }
 0x2ad   : > { %v665_v35 = vpop.xlane.xlu0 %664 }
 0x2ae   : > { %v673_v36 = vadd.f32 %v665_v35, %v657_v34  ;;  %v1065_v34 = vsel %vm716_vm3, %v1326_v32, 0 }
 0x2af   : > { %v913_v37 = vld [vmem:[#allocation3] sm:$0xff] }
 0x2b0   : > { %678 = vst.msk [vmem:[#allocation3 + $0x8] sm:$0xff] %vm377_vm2, %v673_v36  ;;  %1523 = vrcp.f32 %v913_v37 }
 0x2b5   : > { %v668_v41 = vpop.xlane.xlu1 %667  ;;  %v693_v63 = vpop.permute.xlu0 %692 }
 0x2b6   : > { %v674_v42 = vadd.f32 %v668_v41, %v658_v40  ;;  %v706_v1 = vmul.f32 %v693_v63, %v682_v62 }
 0x2b7   : > { %v914_v43 = vld [vmem:[#allocation3 + $0x8] sm:$0xff] }
 0x2b8   : > { %679 = vst.msk [vmem:[#allocation3 + $0x10] sm:$0xff] %vm377_vm2, %v674_v42  ;;  %1525 = vrcp.f32 %v914_v43 }
 0x2b9   : > { %v703_v12 = vpop.permute.xlu0 %702 }
 0x2ba   : > { %v1524_v45 = vpop.eup %1523  ;;  %v708_v13 = vmul.f32 %v703_v12, %v684_v11 }
 0x2bb   : > { %927 = vperm.xlu1 %1506, %v1524_v45   ;;  %v953_v45 = vld [vmem:[%s371_s27] sm:$0xff]  ;;  %s1537_s27 = scalar_lea.vmem %s1536_s20, 256 }
 0x2bc   : > { %p1539_p2 = scmp.lt.s32.totalorder %s1537_s27, %s1531_s24 }
 0x2bd   : > { %v671_v47 = vpop.xlane.xlu1 %670 }
 0x2be   : > { %v675_v48 = vadd.f32 %v671_v47, %v659_v46  ;;  %v1322_v46 = vld [vmem:[%s1947_s5] ss:$0 sm:$0xff]  ;;  %p1540_p3 = por %p1539_p2, %p1538_p1 }
 0x2bf   : > { %697 = vperm.xlu1 %1506, %v1522_v38   ;;  %v915_v49 = vld [vmem:[#allocation3 + $0x10] sm:$0xff]  ;;  %v1328_v38 = vld [vmem:[%s1946_s4 + $0xc] sm:$0xf] }
 0x2c0   : > { %680 = vst.msk [vmem:[#allocation3 + $0x18] sm:$0xff] %vm377_vm2, %v675_v48  ;;  %1527 = vrcp.f32 %v915_v49  ;;  %v1114_v40 = vsel %vm716_vm3, %v1328_v38, 0  ;;  %p1541_p5 = pnand %p1540_p3, %p1534_p0 }
 0x2c1   : > { %v688_v55 = vpop.permute.xlu1 %687 }
 0x2c2   : > { %v1526_v50 = vpop.eup %1525  ;;  %v705_v56 = vmul.f32 %v688_v55, %v681_v54 }
 0x2c3   : > { %932 = vperm.xlu1 %1506, %v1526_v50  }
 0x2c7   : > { %v916_v51 = vld [vmem:[#allocation3 + $0x18] sm:$0xff] }
 0x2c8   : > { %1529 = vrcp.f32 %v916_v51 }
 0x2ca   : > { %v1528_v52 = vpop.eup %1527 }
 0x2cb   : > { %937 = vperm.xlu1 %1506, %v1528_v52  }
 0x2d2   : > { %v1530_v53 = vpop.eup %1529 }
 0x2d3   : > { %942 = vperm.xlu0 %1505, %v1530_v53  }
 0x2ec   : > { %v754_v57 = vpop.f32.mrb[0].mxu0 }
 0x2ed   : > { %v898_v58 = vadd.f32 %v754_v57, %v705_v56  ;;  %v1389_v59 = vpop.f32.mrb[1].mxu0 }
 0x2ee   : > { %v757_v60 = vpop.f32.mrb[2].mxu0 }
 0x2ef   : > { %902 = vst.msk [vmem:[#allocation4] sm:$0xff] %vm386_vm0, %v898_v58  ;;  %v1390_v61 = vpop.f32.mrb[3].mxu0 }
 0x2f4   : > { %v800_v2 = vpop.f32.mrb[16].mxu1 }
 0x2f5   : > { %v899_v3 = vadd.f32 %v800_v2, %v706_v1  ;;  %v1395_v4 = vpop.f32.mrb[17].mxu1 }
 0x2f6   : > { %v803_v5 = vpop.f32.mrb[18].mxu1  ;;  %v921_v19 = vld [vmem:[#allocation4] sm:$0xff] }
 0x2f7   : > { %903 = vst.msk [vmem:[#allocation4 + $0x8] sm:$0xff] %vm386_vm0, %v899_v3  ;;  %v1396_v6 = vpop.f32.mrb[19].mxu1 }
 0x2fc   : > { %v846_v7 = vpop.f32.mrb[4].mxu0 }
 0x2fd   : > { %v1401_v8 = vpop.f32.mrb[5].mxu0 }
 0x2fe   : > { %v849_v9 = vpop.f32.mrb[6].mxu0  ;;  %v922_v30 = vld [vmem:[#allocation4 + $0x8] sm:$0xff] }
 0x2ff   : > { %v1402_v10 = vpop.f32.mrb[7].mxu0 }
 0x304   : > { %v892_v14 = vpop.f32.mrb[20].mxu1 }
 0x305   : > { %v901_v15 = vadd.f32 %v892_v14, %v708_v13  ;;  %v1407_v16 = vpop.f32.mrb[21].mxu1 }
 0x306   : > { %v895_v17 = vpop.f32.mrb[22].mxu1 }
 0x307   : > { %905 = vst.msk [vmem:[#allocation4 + $0x18] sm:$0xff] %vm386_vm0, %v901_v15  ;;  %v1408_v18 = vpop.f32.mrb[23].mxu1 }
 0x30e   : > { %v924_v42 = vld [vmem:[#allocation4 + $0x18] sm:$0xff] }
 0x33a   : > { %v928_v20 = vpop.permute.xlu1 %927 }
 0x33b   : > { %v945_v22 = vmul.f32 %v928_v20, %v921_v19 }
 0x33d   : > { %v949_v24 = vpack.c.bf16 %v945_v22, %v945_v22 }
 0x33e   : > { %v698_v26 = vpop.permute.xlu1 %697 }
 0x33f   : > { %v707_v27 = vmul.f32 %v698_v26, %v683_v23  ;;  %1412 = vmatmul.mubr.msk.bf16.vlgmr.msra.gmra.mrb[8].mxu0 %vm386_vm0, %v949_v24 }
 0x340   : > { %1416 = vmatpush3.bf16.msra.mxu0 %v1016_v25  ;;  %1417 = vmatprep.mubr.msk.bf16.mxu0 %vm1612_vm1, %v1611_v0 }
 0x341   : > { %v900_v28 = vadd.f32 %v846_v7, %v707_v27  ;;  %1421 = vmatprep.subr.bf16.mxu0 %v1611_v0 }
 0x342   : > { %v933_v29 = vpop.permute.xlu1 %932 }
 0x343   : > { %904 = vst.msk [vmem:[#allocation4 + $0x10] sm:$0xff] %vm386_vm0, %v900_v28  ;;  %v946_v31 = vmul.f32 %v933_v29, %v922_v30 }
 0x345   : > { %v950_v33 = vpack.c.bf16 %v946_v31, %v946_v31 }
 0x34a   : > { %v923_v35 = vld [vmem:[#allocation4 + $0x10] sm:$0xff]  ;;  %v938_v36 = vpop.permute.xlu1 %937 }
 0x34b   : > { %1418 = vmatmul.mubr.msk.bf16.vlgmr.msra.gmra.mrb[8].mxu0 %vm386_vm0, %v950_v33  ;;  %v947_v37 = vmul.f32 %v938_v36, %v923_v35 }
 0x34c   : > { %1422 = vmatpush3.bf16.msra.mxu0 %v1065_v34  ;;  %1423 = vmatprep.mubr.msk.bf16.mxu0 %vm1612_vm1, %v1611_v0 }
 0x34d   : > { %1427 = vmatprep.subr.bf16.mxu0 %v1611_v0  ;;  %v951_v39 = vpack.c.bf16 %v947_v37, %v947_v37 }
 0x352   : > { %v943_v41 = vpop.permute.xlu0 %942 }
 0x353   : > { %v948_v43 = vmul.f32 %v943_v41, %v924_v42 }
 0x355   : > { %v952_v44 = vpack.c.bf16 %v948_v43, %v948_v43 }
 0x357   : > { %1424 = vmatmul.mubr.msk.bf16.vlgmr.msra.gmra.mrb[8].mxu0 %vm386_vm0, %v951_v39 }
 0x358   : > { %1428 = vmatpush3.bf16.msra.mxu0 %v1114_v40  ;;  %1429 = vmatprep.mubr.msk.bf16.mxu0 %vm1612_vm1, %v1611_v0  ;;  %v961_v0 = vadd.f32 %v1322_v46, %v953_v45 }
 0x363   : > { %1430 = vmatmul.mubr.msk.bf16.vlgmr.msra.gmra.mrb[8].mxu0 %vm386_vm0, %v952_v44 }
 0x436   : > { %v1150_v47 = vpop.f32.mrb[8].mxu0 }
 0x437   : > { %v1433_v48 = vadd.f32 %v1150_v47, %v961_v0  ;;  %v1431_v49 = vpop.f32.mrb[9].mxu0 }
 0x438   : > { %v1153_v50 = vpop.f32.mrb[10].mxu0 }
 0x439   : > { %1157 = vst [vmem:[%s340_s13] sm:$0xff] %v1433_v48  ;;  %v1432_v51 = vpop.f32.mrb[11].mxu0 }
 0x43a   : > { %1544 = shalt.err (!%p1541_p5)
}
 0x43b   : > { %s1545_s18 = scalar_lea.hbm %s1895_s16, 128  ;;  %s1549_s8 = scalar_lea.hbm %s1948_s6, 256 }
 0x43c   : > { %p1546_p6 = scmp.ne.s32.totalorder %s1895_s16, %s1545_s18  ;;  %p1550_p10 = scmp.lt.u32.totalorder %s1895_s16, %s1948_s6 }
 0x43d   : > { %p1551_p11 = scmp.lt.u32.totalorder %s1549_s8, %s1545_s18  ;;  %p1553_p13 = scmp.lt.u32.totalorder %s1545_s18, %s1895_s16 }
 0x43e   : > { %p1547_p7 = pnand %p1546_p6, %p1691_p4 }
 0x43f   : > { %p1552_p12 = por %p1551_p11, %p1550_p10 }
 0x440   : > { %p1548_p9 = pneg %p1547_p7 }
 0x441   : > { %p1554_p0 = por %p1553_p13, %p1552_p12 }
 0x443   : > { %p1555_p1 = pnand %p1554_p0, %p1548_p9 }
 0x445   : > { %1558 = shalt.err (!%p1555_p1)
}
 0x446   : > { %1446 = dma.vmem_to_hbm [thread:$0]  (%p1691_p4), %s1897_s14, 128, %s1895_s16, %s1159_s17  }
 0x447 PF: > { %p1452_p2 = scmp.ge.s32.totalorder %s1609_s26, 2  ;;  %s1185_s11 = sand.u32 1, %s1589_s21  }
 0x448   : > { %s1186_s15 = scalar_lea.sflag [#allocation6], %s1185_s11 }
 0x449   : > { %p1449_p3 = pnand %p1452_p2, %p1698_p8 }
 0x44b   : > { %1584 = dma.done.wait (!%p1449_p3), %s1186_s15, 128  }
 0x44c   : > { %1586 = vsyncadd (!%p1449_p3), %s1186_s15, 4294967168  ;;  %s19_s26 = sadd.s32 1, %s1609_s26   ;;  %s1951_s21 = smov %s1593_s22 }
 0x44d   : > { %p16_p5 = scmp.ge.s32.totalorder %s19_s26, 4   ;;  %s1952_s22 = smov %s1597_s23 }
 0x44e   : > { %s1953_s23 = smov %s1704_s10  ;;  %s1954_s24 = smov %s1605_s25 }
 0x44f   : > { %s1955_s25 = smov %s1957_s29  ;;  %18 = sbr.rel (!%p16_p5) target bundleno = 4 (0x4), region = 99 }
 0x456   :  { %1191 = vsyncpa [#allocation6], 1 }
 0x457   :  { %1193 = vsyncpa [#allocation6 + $0x1], 1 }

</bundles_post_ra>
